<compile_context>
chip_gen: v7x
topology: tpu7x:2x2x1
jax: 0.10.0
libtpu: 0.0.40
codegen_flags: <defaults>
</compile_context>

<pallas_src>
import jax
import jax.numpy as jnp
import numpy as np
from jax.experimental import pallas as pl
from jax.experimental.pallas import tpu as pltpu


# ---------------------------------------------------------------------------
# Pallas kernel: adaptive-attention classification head (Bt batch rows / step)
# ---------------------------------------------------------------------------
def adaptive_head_kernel(hidden_ref, pooled_ref, mask_ref,
                         wg_p_ref, wfc_t_ref, bfc_ref, bg_ref,
                         logits_ref):
    hidden = hidden_ref[...]                       # (Bt, S, H) bf16
    pooled = pooled_ref[...]                       # (Bt, H)    f32
    mask   = mask_ref[...]                         # (Bt, S)    f32 0/1

    # scores[b, s] = <pooled[b], hidden[b, s]>   (batched matvec, f32 acc)
    q = pooled.astype(jnp.bfloat16)[:, None, :]    # (Bt, 1, H)
    scores = jnp.einsum("bqh,bsh->bqs", q, hidden,
                        preferred_element_type=jnp.float32)[:, 0, :]   # (Bt, S)

    # mask + numerically-stable softmax over the sequence axis (f32)
    scores = jnp.where(mask == 0.0, -1e9, scores)
    m = jnp.max(scores, axis=-1, keepdims=True)
    e = jnp.exp(scores - m)
    denom = jnp.sum(e, axis=-1, keepdims=True)
    base_attn = e * pl.reciprocal(denom, approx=True)                  # (Bt, S)

    # gate = sigmoid(W_g [pooled ; sentinel] + b_g); the sentinel half is
    # batch-constant and has been folded into bg_eff on the host.
    gate_logit = (jnp.sum(pooled * wg_p_ref[...], axis=-1, keepdims=True)
                  + bg_ref[0])                                         # (Bt, 1)
    gate = jax.nn.sigmoid(gate_logit)

    # mixed = [(1-gate)*attn, gate*0]; the sentinel slot is exactly zero, so
    # the bmm with [hidden ; sentinel] reduces to (1-gate)*attn @ hidden.
    mixed = ((1.0 - gate) * base_attn).astype(jnp.bfloat16)            # (Bt, S)
    ctx = jnp.einsum("bqs,bsh->bqh", mixed[:, None, :], hidden,
                     preferred_element_type=jnp.float32)[:, 0, :]      # (Bt, H)

    combined = pooled + ctx                                            # (Bt, H)

    # logits = combined @ W_fc^T + b_fc  (W_fc pre-transposed + class-padded ->
    # lane-dense (Bt, Cpad) output slab)
    logits = jnp.dot(combined, wfc_t_ref[...],
                     preferred_element_type=jnp.float32) + bfc_ref[...]
    logits_ref[...] = logits.astype(logits_ref.dtype)


def adaptive_attention_head(hidden, pooled, mask, sentinel, wg, bg, wfc, bfc,
                            *, block_b=64):
    """hidden (B,S,H), pooled (B,H), mask (B,S) float 0/1,
    wg (1,2H), bg (1,), wfc (C,H), bfc (C,).  Returns logits (B,C) f32."""
    B, S, H = hidden.shape
    C = wfc.shape[0]

    # (1) fold the batch-constant sentinel half of the gate into the bias
    bg_eff = (bg.astype(jnp.float32)
              + jnp.sum(sentinel.astype(jnp.float32)
                        * wg[0, H:].astype(jnp.float32))).reshape(1)
    wg_p = wg[:, :H].astype(jnp.float32)                           # (1, H)

    # (2) lane-dense logits: pad class dim to a multiple of 128 and
    #     pre-transpose the fc weight so the final dot needs no transpose
    c_pad = ((C + 127) // 128) * 128
    wfc_t = jnp.zeros((H, c_pad), jnp.float32).at[:, :C].set(
        wfc.astype(jnp.float32).T)
    bfc_p = jnp.zeros((1, c_pad), jnp.float32).at[0, :C].set(
        bfc.astype(jnp.float32))

    # (3) block the grid over the batch (Bt rows / step, sublane-aligned)
    bt = min(block_b, ((B + 7) // 8) * 8)
    b_pad = ((B + bt - 1) // bt) * bt
    pad = b_pad - B

    hidden_bf = hidden.astype(jnp.bfloat16)        # (4) halve HBM traffic
    pooled_f = pooled.astype(jnp.float32)
    mask_f = mask.astype(jnp.float32)
    if pad:
        hidden_bf = jnp.pad(hidden_bf, ((0, pad), (0, 0), (0, 0)))
        pooled_f = jnp.pad(pooled_f, ((0, pad), (0, 0)))
        mask_f = jnp.pad(mask_f, ((0, pad), (0, 0)))  # padded rows sliced off below

    # VMEM budget: double-buffered per-step tiles + resident weights.
    # Capped at 64 MiB so the same choice is safe on v7x (64 MiB / TC).
    step_bytes = bt * S * H * 2 + bt * (H + S + c_pad) * 4
    resident = (H * c_pad + H + c_pad) * 4
    vmem_limit = int(min(64 << 20,
                         max(32 << 20, 2 * step_bytes + resident + (2 << 20))))

    out = pl.pallas_call(
        adaptive_head_kernel,
        out_shape=jax.ShapeDtypeStruct((b_pad, c_pad), jnp.float32),
        grid_spec=pltpu.PrefetchScalarGridSpec(
            num_scalar_prefetch=0,
            grid=(b_pad // bt,),
            in_specs=[
                pl.BlockSpec((bt, S, H), lambda b: (b, 0, 0)),      # hidden (bf16)
                pl.BlockSpec((bt, H),    lambda b: (b, 0)),         # pooled
                pl.BlockSpec((bt, S),    lambda b: (b, 0)),         # mask
                pl.BlockSpec((1, H),     lambda b: (0, 0)),         # wg_p  (resident)
                pl.BlockSpec((H, c_pad), lambda b: (0, 0)),         # wfc^T (resident)
                pl.BlockSpec((1, c_pad), lambda b: (0, 0)),         # bfc   (resident)
                pl.BlockSpec(memory_space=pltpu.MemorySpace.SMEM),  # bg_eff scalar
            ],
            out_specs=pl.BlockSpec((bt, c_pad), lambda b: (b, 0)),
        ),
        compiler_params=pltpu.CompilerParams(
            dimension_semantics=("parallel",),      # shard batch tiles across TCs
            vmem_limit_bytes=vmem_limit),
    )(hidden_bf, pooled_f, mask_f, wg_p, wfc_t, bfc_p, bg_eff)

    return out[:B, :C]


# ---------------------------------------------------------------------------
# Synthetic stand-in for BertModel.from_pretrained (plain-JAX glue)
# ---------------------------------------------------------------------------
# TODO(synk): the pretrained BERT encoder has no self-contained Pallas
# equivalent; it is replaced by a deterministic synthetic encoder (embedding
# lookup + tanh projection + [CLS] pooler) producing tensors with the same
# shapes/dtypes as BERT's (last_hidden_state, pooled_output).
def synthetic_bert(context, params):
    B, S = context.shape
    emb = params["tok_emb"][context] + params["pos_emb"][None, :S, :]     # (B,S,H)
    last_hidden_state = jnp.tanh(emb @ params["w_enc"])                   # (B,S,H)
    pooled = jnp.tanh(last_hidden_state[:, 0, :] @ params["w_pool"]
                      + params["b_pool"])                                 # (B,H)
    return last_hidden_state, pooled


# ---------------------------------------------------------------------------
# Pure-JAX f32 reference of the head (for correctness check)
# ---------------------------------------------------------------------------
def reference_head(hidden, pooled, mask, sentinel, wg, bg, wfc, bfc):
    B, S, H = hidden.shape
    scores = jnp.einsum("bh,bsh->bs", pooled, hidden)
    scores = jnp.where(mask == 0.0, -1e9, scores)
    base_attn = jax.nn.softmax(scores, axis=1)
    sent_b = jnp.broadcast_to(sentinel[None, :], (B, H))
    gate_in = jnp.concatenate([pooled, sent_b], axis=1)
    gate = jax.nn.sigmoid(gate_in @ wg.T + bg)                            # (B,1)
    sentinel_attn = jnp.zeros((B, 1), jnp.float32)
    mixed = jnp.concatenate([(1.0 - gate) * base_attn, gate * sentinel_attn], axis=1)
    ctx_vecs = jnp.concatenate([hidden, jnp.broadcast_to(sentinel[None, None, :],
                                                         (B, 1, H))], axis=1)
    ctx = jnp.einsum("bs,bsh->bh", mixed, ctx_vecs)
    combined = pooled + ctx
    return combined @ wfc.T + bfc


if __name__ == "__main__":
    B, S, H, C, VOCAB = 2, 8, 32, 4, 50

    key = jax.random.PRNGKey(0)
    ks = jax.random.split(key, 10)

    # synthetic-encoder params
    bert_params = {
        "tok_emb": jax.random.normal(ks[0], (VOCAB, H), jnp.float32) * 0.1,
        "pos_emb": jax.random.normal(ks[1], (S, H), jnp.float32) * 0.1,
        "w_enc":   jax.random.normal(ks[2], (H, H), jnp.float32) * 0.1,
        "w_pool":  jax.random.normal(ks[3], (H, H), jnp.float32) * 0.1,
        "b_pool":  jax.random.normal(ks[4], (H,), jnp.float32) * 0.1,
    }
    # head params (shapes follow the nn.Module __init__)
    sentinel = jax.random.normal(ks[5], (H,), jnp.float32)            # (H,)
    wg = jax.random.normal(ks[6], (1, 2 * H), jnp.float32) * 0.1      # gate_proj.weight
    bg = jnp.zeros((1,), jnp.float32)                                 # gate_proj.bias
    wfc = jax.random.normal(ks[7], (C, H), jnp.float32) * 0.1         # fc.weight
    bfc = jnp.zeros((C,), jnp.float32)                                # fc.bias

    # inputs: x = (context_token_ids, _, attention_mask)
    context = jax.random.randint(ks[8], (B, S), 0, VOCAB, jnp.int32)
    mask = jnp.array([[1, 1, 1, 1, 1, 1, 1, 1],
                      [1, 1, 1, 1, 1, 0, 0, 0]], jnp.float32)

    last_hidden_state, pooled = synthetic_bert(context, bert_params)

    logits = adaptive_attention_head(last_hidden_state, pooled, mask,
                                     sentinel, wg, bg, wfc, bfc)
    logits = jax.block_until_ready(logits)

    ref = reference_head(last_hidden_state, pooled, mask, sentinel, wg, bg, wfc, bfc)
    # hidden/attn are streamed/multiplied in bf16 (f32 accumulation) -> ~1e-3 abs err
    np.testing.assert_allclose(np.asarray(logits), np.asarray(ref),
                               rtol=1e-2, atol=1e-2)

    probabilities = jax.nn.softmax(logits, axis=1)  # stored attribute in the module
    _ = jax.block_until_ready(probabilities)

    print("KERNEL_OK")
</pallas_src>

<mosaic_0001>
module attributes {stable_mosaic.version = 11 : i64} {
  func.func @adaptive_head_kernel(%arg0: i32, %arg1: memref<8x8x32xbf16, #tpu.memory_space<vmem>>, %arg2: memref<8x32xf32, #tpu.memory_space<vmem>>, %arg3: memref<8x8xf32, #tpu.memory_space<vmem>>, %arg4: memref<1x32xf32, #tpu.memory_space<vmem>>, %arg5: memref<32x128xf32, #tpu.memory_space<vmem>>, %arg6: memref<1x128xf32, #tpu.memory_space<vmem>>, %arg7: memref<1xf32, #tpu.memory_space<smem>>, %arg8: memref<8x128xf32, #tpu.memory_space<vmem>>) attributes {dimension_semantics = [#tpu.dimension_semantics<parallel>], iteration_bounds = array<i64: 1>, scalar_prefetch = 0 : i64, scratch_operands = 0 : i64, tpu.core_type = #tpu.core_type<tc>, window_params = [{transform_indices = @transform_0, window_bounds = array<i64: 8, 8, 32>}, {transform_indices = @transform_1, window_bounds = array<i64: 8, 32>}, {transform_indices = @transform_2, window_bounds = array<i64: 8, 8>}, {pipeline_mode = #tpu.pipeline_mode<synchronous>, transform_indices = @transform_3, window_bounds = array<i64: 1, 32>}, {pipeline_mode = #tpu.pipeline_mode<synchronous>, transform_indices = @transform_4, window_bounds = array<i64: 32, 128>}, {pipeline_mode = #tpu.pipeline_mode<synchronous>, transform_indices = @transform_5, window_bounds = array<i64: 1, 128>}, {transform_indices = @transform_6, window_bounds = array<i64: 1>}, {transform_indices = @transform_7, window_bounds = array<i64: 8, 128>}]} {
    %c0 = arith.constant 0 : index
    %c0_0 = arith.constant 0 : index
    %c0_1 = arith.constant 0 : index
    %0 = vector.load %arg1[%c0, %c0_0, %c0_1] : memref<8x8x32xbf16, #tpu.memory_space<vmem>>, vector<8x8x32xbf16>
    %c0_2 = arith.constant 0 : index
    %c0_3 = arith.constant 0 : index
    %1 = vector.load %arg2[%c0_2, %c0_3] : memref<8x32xf32, #tpu.memory_space<vmem>>, vector<8x32xf32>
    %c0_4 = arith.constant 0 : index
    %c0_5 = arith.constant 0 : index
    %2 = vector.load %arg3[%c0_4, %c0_5] : memref<8x8xf32, #tpu.memory_space<vmem>>, vector<8x8xf32>
    %3 = arith.truncf %1 : vector<8x32xf32> to vector<8x32xbf16>
    %4 = vector.shape_cast %3 : vector<8x32xbf16> to vector<8x1x32xbf16>
    "tpu.trace_start"() <{level = 10 : i32, message = "bqh,bsh->bqs"}> : () -> ()
    %cst = arith.constant dense<0.000000e+00> : vector<8x1x8xf32>
    %5 = tpu.matmul %4, %0, %cst {dimension_numbers = #tpu.dot_dimension_numbers<[2], [2], [1], [1], [0, 0, 0, 1, 1, 1], [0], [0]>} : vector<8x1x32xbf16>, vector<8x8x32xbf16>, vector<8x1x8xf32> -> vector<8x1x8xf32>
    "tpu.trace_stop"() : () -> ()
    %6 = vector.shape_cast %5 : vector<8x1x8xf32> to vector<8x8xf32>
    %cst_6 = arith.constant 0.000000e+00 : f32
    %7 = vector.broadcast %cst_6 : f32 to vector<8x8xf32>
    %8 = arith.cmpf oeq, %2, %7 : vector<8x8xf32>
    %cst_7 = arith.constant -1.000000e+09 : f32
    %9 = vector.broadcast %cst_7 : f32 to vector<8x8xf32>
    %10 = arith.select %8, %9, %6 : vector<8x8xi1>, vector<8x8xf32>
    %cst_8 = arith.constant dense<0xFF800000> : vector<8xf32>
    %11 = vector.multi_reduction <maximumf>, %10, %cst_8 [1] : vector<8x8xf32> to vector<8xf32>
    %12 = vector.shape_cast %11 : vector<8xf32> to vector<8x1xf32>
    %13 = vector.broadcast %12 : vector<8x1xf32> to vector<8x8xf32>
    %14 = arith.subf %10, %13 : vector<8x8xf32>
    %15 = math.exp %14 : vector<8x8xf32>
    %cst_9 = arith.constant dense<0.000000e+00> : vector<8xf32>
    %16 = vector.multi_reduction <add>, %15, %cst_9 [1] : vector<8x8xf32> to vector<8xf32>
    %17 = vector.shape_cast %16 : vector<8xf32> to vector<8x1xf32>
    %18 = tpu.reciprocal %17 {approx = true} : vector<8x1xf32> -> vector<8x1xf32>
    %19 = vector.broadcast %18 : vector<8x1xf32> to vector<8x8xf32>
    %20 = arith.mulf %15, %19 : vector<8x8xf32>
    %c0_10 = arith.constant 0 : index
    %c0_11 = arith.constant 0 : index
    %21 = vector.load %arg4[%c0_10, %c0_11] : memref<1x32xf32, #tpu.memory_space<vmem>>, vector<1x32xf32>
    %22 = vector.broadcast %21 : vector<1x32xf32> to vector<8x32xf32>
    %23 = arith.mulf %1, %22 : vector<8x32xf32>
    %cst_12 = arith.constant dense<0.000000e+00> : vector<8xf32>
    %24 = vector.multi_reduction <add>, %23, %cst_12 [1] : vector<8x32xf32> to vector<8xf32>
    %25 = vector.shape_cast %24 : vector<8xf32> to vector<8x1xf32>
    %c0_13 = arith.constant 0 : index
    %26 = memref.load %arg7[%c0_13] : memref<1xf32, #tpu.memory_space<smem>>
    %27 = vector.broadcast %26 : f32 to vector<8x1xf32>
    %28 = arith.addf %25, %27 : vector<8x1xf32>
    %29 = arith.negf %28 : vector<8x1xf32>
    %30 = math.exp %29 : vector<8x1xf32>
    %cst_14 = arith.constant 1.000000e+00 : f32
    %31 = vector.broadcast %cst_14 : f32 to vector<8x1xf32>
    %32 = arith.addf %31, %30 : vector<8x1xf32>
    %33 = arith.divf %31, %32 : vector<8x1xf32>
    %cst_15 = arith.constant 1.000000e+00 : f32
    %34 = vector.broadcast %cst_15 : f32 to vector<8x1xf32>
    %35 = arith.subf %34, %33 : vector<8x1xf32>
    %36 = vector.broadcast %35 : vector<8x1xf32> to vector<8x8xf32>
    %37 = arith.mulf %36, %20 : vector<8x8xf32>
    %38 = arith.truncf %37 : vector<8x8xf32> to vector<8x8xbf16>
    %39 = vector.shape_cast %38 : vector<8x8xbf16> to vector<8x1x8xbf16>
    "tpu.trace_start"() <{level = 10 : i32, message = "bqs,bsh->bqh"}> : () -> ()
    %cst_16 = arith.constant dense<0.000000e+00> : vector<8x1x32xf32>
    %40 = tpu.matmul %39, %0, %cst_16 {dimension_numbers = #tpu.dot_dimension_numbers<[2], [1], [1], [2], [0, 0, 0, 1, 1, 2], [0], [0]>} : vector<8x1x8xbf16>, vector<8x8x32xbf16>, vector<8x1x32xf32> -> vector<8x1x32xf32>
    "tpu.trace_stop"() : () -> ()
    %41 = vector.shape_cast %40 : vector<8x1x32xf32> to vector<8x32xf32>
    %42 = arith.addf %1, %41 : vector<8x32xf32>
    %c0_17 = arith.constant 0 : index
    %c0_18 = arith.constant 0 : index
    %43 = vector.load %arg5[%c0_17, %c0_18] : memref<32x128xf32, #tpu.memory_space<vmem>>, vector<32x128xf32>
    %cst_19 = arith.constant dense<0.000000e+00> : vector<8x128xf32>
    %44 = tpu.matmul %42, %43, %cst_19 {dimension_numbers = #tpu.dot_dimension_numbers<[1], [0], [0], [1], [0, 0, 1, 1], [], []>} : vector<8x32xf32>, vector<32x128xf32>, vector<8x128xf32> -> vector<8x128xf32>
    %c0_20 = arith.constant 0 : index
    %c0_21 = arith.constant 0 : index
    %45 = vector.load %arg6[%c0_20, %c0_21] : memref<1x128xf32, #tpu.memory_space<vmem>>, vector<1x128xf32>
    %46 = vector.broadcast %45 : vector<1x128xf32> to vector<8x128xf32>
    %47 = arith.addf %44, %46 : vector<8x128xf32>
    %c0_22 = arith.constant 0 : index
    %c0_23 = arith.constant 0 : index
    %48 = vector.load %arg8[%c0_22, %c0_23] : memref<8x128xf32, #tpu.memory_space<vmem>>, vector<8x128xf32>
    tpu.vector_store %arg8[%c0_22, %c0_23], %47 {strides = array<i32>} : memref<8x128xf32, #tpu.memory_space<vmem>>, vector<8x128xf32>,
    return
  }
  func.func @transform_0(%arg0: i32) -> (i32, i32, i32) {
    %c0_i32 = arith.constant 0 : i32
    %c0_i32_0 = arith.constant 0 : i32
    %c0_i32_1 = arith.constant 0 : i32
    return %arg0, %c0_i32, %c0_i32_0 : i32, i32, i32
  }
  func.func @transform_1(%arg0: i32) -> (i32, i32) {
    %c0_i32 = arith.constant 0 : i32
    %c0_i32_0 = arith.constant 0 : i32
    return %arg0, %c0_i32 : i32, i32
  }
  func.func @transform_2(%arg0: i32) -> (i32, i32) {
    %c0_i32 = arith.constant 0 : i32
    %c0_i32_0 = arith.constant 0 : i32
    return %arg0, %c0_i32 : i32, i32
  }
  func.func @transform_3(%arg0: i32) -> (i32, i32) {
    %c0_i32 = arith.constant 0 : i32
    %c0_i32_0 = arith.constant 0 : i32
    %c0_i32_1 = arith.constant 0 : i32
    return %c0_i32, %c0_i32_0 : i32, i32
  }
  func.func @transform_4(%arg0: i32) -> (i32, i32) {
    %c0_i32 = arith.constant 0 : i32
    %c0_i32_0 = arith.constant 0 : i32
    %c0_i32_1 = arith.constant 0 : i32
    return %c0_i32, %c0_i32_0 : i32, i32
  }
  func.func @transform_5(%arg0: i32) -> (i32, i32) {
    %c0_i32 = arith.constant 0 : i32
    %c0_i32_0 = arith.constant 0 : i32
    %c0_i32_1 = arith.constant 0 : i32
    return %c0_i32, %c0_i32_0 : i32, i32
  }
  func.func @transform_6(%arg0: i32) -> i32 {
    %c0_i32 = arith.constant 0 : i32
    %c0_i32_0 = arith.constant 0 : i32
    return %c0_i32 : i32
  }
  func.func @transform_7(%arg0: i32) -> (i32, i32) {
    %c0_i32 = arith.constant 0 : i32
    %c0_i32_0 = arith.constant 0 : i32
    return %arg0, %c0_i32 : i32, i32
  }
}

</mosaic_0001>

<bundles_post_ra>
// kernel: tpu_custom_call.1
= control target key start
LH: loop header
LB: loop body
LE: loop exit
PB: predicated region body
PF: predicated region fallthrough
CT: control target
= control target key end

     0   :  { %13 = vsyncpa [#allocation4], 0  ;;  %s1722_s0 = inlined_call_operand.hbm [shape: bf16[8,8,32], index: 0, kind: input, shape index: {}]   ;;  %s1723_s1 = inlined_call_operand.hbm [shape: f32[8,32], index: 1, kind: input, shape index: {}]   ;;  %s1724_s2 = inlined_call_operand.vmem [shape: f32[8,8], index: 2, kind: input, shape index: {}]   ;;  %s1725_s3 = inlined_call_operand.vmem [shape: f32[1,32], index: 3, kind: input, shape index: {}]   ;;  %s1726_s4 = inlined_call_operand.hbm [shape: f32[32,128], index: 4, kind: input, shape index: {}]   ;;  %s1727_s5 = inlined_call_operand.vmem [shape: f32[1,128], index: 5, kind: input, shape index: {}]   ;;  %s1728_s6 = inlined_call_operand.<no memory space> [shape: f32[1], index: 6, kind: input, shape index: {}]   ;;  %s1729_s7 = inlined_call_operand.hbm [shape: f32[8,128], index: 7, kind: output, shape index: {}]  }
   0x1   :  { %14 = vsyncpa [#allocation7], 0 }
   0x2   :  { %15 = vsyncpa [#allocation5], 0  ;;  %s1439_s24 = smov [#allocation6]   ;;  %s1440_s26 = smov [#allocation3]  }
   0x3   :  { %s34_s25 = sshll.u32 %s1439_s24, 4  ;;  %s21_s27 = sshll.u32 %s1440_s26, 4  ;;  %s35_s25 = int_to_ptr.vmem [resolvable:$true] %s34_s25  ;;  %s1491_s27 = int_to_ptr.vmem [resolvable:$true] %s21_s27 }
   0x4   :  { %s1345_s30 = scalar_lea.hbm %s1723_s1, 128 }
   0x5   :  { %p1346_p0 = scmp.ne.s32.totalorder %s1723_s1, %s1345_s30  ;;  %p1349_p1 = scmp.lt.u32.totalorder %s1345_s30, %s1723_s1 }
   0x7   :  { %p1351_p2 = pnand %p1349_p1, %p1346_p0 }
   0x9   :  { %1354 = shalt.err (!%p1351_p2)
}
   0xa   :  { %s1355_s12 = scalar_lea.vmem %s35_s25, 128  ;;  %p1360_p4 = scmp.lt.s32.totalorder %s35_s25, %s35_s25 }
   0xb   :  { %p1356_p3 = scmp.ne.s32.totalorder %s35_s25, %s1355_s12  ;;  %p1361_p5 = scmp.lt.s32.totalorder %s1355_s12, %s1355_s12 }
   0xd   :  { %p1362_p6 = por %p1361_p5, %p1360_p4 }
   0xf   :  { %p1363_p7 = pnand %p1362_p6, %p1356_p3 }
  0x11   :  { %1366 = shalt.err (!%p1363_p7)
}
  0x12   :  { %37 = dma.hbm_to_vmem [thread:$0]  %s1723_s1, 128, %s35_s25, [#allocation7]  }
  0x13   :  { %s1367_s17 = scalar_lea.hbm %s1722_s0, 512 }
  0x14   :  { %p1368_p8 = scmp.ne.s32.totalorder %s1722_s0, %s1367_s17  ;;  %p1371_p9 = scmp.lt.u32.totalorder %s1367_s17, %s1722_s0 }
  0x16   :  { %p1373_p10 = pnand %p1371_p9, %p1368_p8 }
  0x18   :  { %1376 = shalt.err (!%p1373_p10)
}
  0x19   :  { %s1377_s22 = scalar_lea.vmem %s1491_s27, 512  ;;  %p1382_p12 = scmp.lt.s32.totalorder %s1491_s27, %s1491_s27 }
  0x1a   :  { %p1378_p11 = scmp.ne.s32.totalorder %s1491_s27, %s1377_s22  ;;  %p1383_p13 = scmp.lt.s32.totalorder %s1377_s22, %s1377_s22 }
  0x1c   :  { %p1384_p0 = por %p1383_p13, %p1382_p12 }
  0x1e   :  { %p1385_p1 = pnand %p1384_p0, %p1378_p11 }
  0x20   :  { %1388 = shalt.err (!%p1385_p1)
}
  0x21   :  { %s1441_s1 = smov 64   ;;  %s1442_s23 = smov 4  }
  0x22   :  { %27 = dma.hbm_to_vmem [thread:$0]  %s1722_s0, 512, %s1491_s27, [#allocation4], %s1441_s1, %s1441_s1, %s1442_s23  }
  0x23   :  { %s1443_s26 = smov [#allocation8]   ;;  %s1389_s8 = scalar_lea.hbm %s1726_s4, 512 }
  0x24   :  { %s47_s28 = sshll.u32 %s1443_s26, 4  ;;  %p1390_p2 = scmp.ne.s32.totalorder %s1726_s4, %s1389_s8  ;;  %s48_s28 = int_to_ptr.vmem [resolvable:$true] %s47_s28 }
  0x25   :  { %p1393_p3 = scmp.lt.u32.totalorder %s1389_s8, %s1726_s4 }
  0x27   :  { %p1395_p4 = pnand %p1393_p3, %p1390_p2 }
  0x29   :  { %1398 = shalt.err (!%p1395_p4)
}
  0x2a   :  { %s1399_s13 = scalar_lea.vmem %s48_s28, 512  ;;  %p1404_p6 = scmp.lt.s32.totalorder %s48_s28, %s48_s28 }
  0x2b   :  { %p1400_p5 = scmp.ne.s32.totalorder %s48_s28, %s1399_s13  ;;  %p1405_p7 = scmp.lt.s32.totalorder %s1399_s13, %s1399_s13 }
  0x2d   :  { %p1406_p8 = por %p1405_p7, %p1404_p6 }
  0x2f   :  { %p1407_p9 = pnand %p1406_p8, %p1400_p5 }
  0x31   :  { %1410 = shalt.err (!%p1407_p9)
}
  0x32   :  { %s1444_s0 = smov 128   ;;  %s1445_s27 = smov 8  }
  0x33   :  { %53 = dma.hbm_to_vmem [thread:$0]  %s1726_s4, 512, %s48_s28, [#allocation7], %s1444_s0, %s1444_s0, %s1445_s27  }
  0x34   :  { %1433 = dma.done.wait [#allocation4], 512  }
  0x35   :  { %1434 = vsyncadd [#allocation4], 4294966784 }
  0x36   :  { %1435 = dma.done.wait [#allocation7], 640  }
  0x37   :  { %1436 = vsyncadd [#allocation7], 4294966656  ;;  %v1446_v0 = vmov 0.0   ;;  %v83_v1 = vlaneseq  ;;  %vm1447_vm0 = vmmov 0   ;;  %v1448_v2 = vmov 1966171168  }
  0x38   :  { %1212 = vmatprep.subr.bf16.mxu0 %v1446_v0  ;;  %1218 = vmatprep.subr.bf16.mxu1 %v1446_v0  ;;  %v81_v3 = vunpack.c.l.s4 %v1448_v2  ;;  %vm117_vm1 = vcmask 261120   ;;  %v1540_v6 = vld [vmem:[#allocation3] sm:$0xf]  ;;  %v1542_v7 = vld [vmem:[#allocation3 + $0x4] sm:$0xf]  ;;  %vm629_vm2 = vcmask 1043456  }
  0x39   :  { %1214 = vmatprep.mubr.msk.bf16.mxu0 %vm1447_vm0, %v1446_v0  ;;  %1220 = vmatprep.mubr.msk.bf16.mxu1 %vm1447_vm0, %v1446_v0  ;;  %v84_v4 = vshrl.u32 %v83_v1, 7  ;;  %v1544_v8 = vld [vmem:[#allocation6] sm:$0xff]  ;;  %v122_v10 = vsel %vm117_vm1, %v1540_v6, 0  ;;  %v173_v11 = vsel %vm117_vm1, %v1542_v7, 0  ;;  %v1560_v17 = vld [vmem:[#allocation3 + $0x8] sm:$0xf] }
  0x3a   :  { %v82_v5 = vunpack.c.0.s8 %v81_v3  ;;  %1213 = vmatpush3.bf16.xpose.msra.mxu0 %v122_v10  ;;  %1219 = vmatpush3.bf16.xpose.msra.mxu1 %v173_v11  ;;  %v78_v12 = vpack.c.bf16 %v1544_v8, %v1544_v8  ;;  %v1563_v21 = vld [vmem:[#allocation3 + $0xc] sm:$0xf]  ;;  %v224_v23 = vsel %vm117_vm1, %v1560_v17, 0  ;;  %v1578_v31 = vld [vmem:[#allocation3 + $0x10] sm:$0xf]  ;;  %v630_v51 = vsel %vm629_vm2, %v1540_v6, 0 }
  0x3b   :  { %1224 = vmatprep.subr.bf16.mxu0 %v1446_v0  ;;  %1230 = vmatprep.subr.bf16.mxu1 %v1446_v0  ;;  %v1558_v16 = vsub.s32 0, %v84_v4  ;;  %v275_v27 = vsel %vm117_vm1, %v1563_v21, 0  ;;  %v1582_v33 = vld [vmem:[#allocation3 + $0x14] sm:$0xf]  ;;  %v326_v34 = vsel %vm117_vm1, %v1578_v31, 0  ;;  %v680_v53 = vsel %vm629_vm2, %v1542_v7, 0 }
  0x3c   :  { %v1546_v9 = vsub.s32 %v82_v5, %v84_v4  ;;  %v377_v37 = vsel %vm117_vm1, %v1582_v33, 0  ;;  %v1596_v41 = vld [vmem:[#allocation3 + $0x18] sm:$0xf]  ;;  %v1600_v43 = vld [vmem:[#allocation3 + $0x1c] sm:$0xf]  ;;  %vm531_vm3 = vcmask 1041409  }
  0x3d   :  { %v428_v44 = vsel %vm117_vm1, %v1596_v41, 0  ;;  %v479_v47 = vsel %vm117_vm1, %v1600_v43, 0  ;;  %vm534_vm4 = vcmask 1042434   ;;  %vm537_vm5 = vcmask 1043459   ;;  %s1450_s20 = smov [#allocation9]  }
  0x3e   :  { %v86_v13 = vrot.slane %v78_v12, %v1546_v9  ;;  %vm540_vm6 = vcmask 1044484   ;;  %vm543_vm7 = vcmask 1045509   ;;  %vm546_vm8 = vcmask 1046534   ;;  %s1137_s21 = sshll.u32 %s1450_s20, 4  ;;  %s1138_s21 = int_to_ptr.vmem [resolvable:$true] %s1137_s21 }
  0x3f   :  { %vm549_vm9 = vcmask 1047559   ;;  %vm553_vm11 = vcmask 64512   ;;  %s1411_s22 = scalar_lea.vmem %s1138_s21, 128  ;;  %p1416_p11 = scmp.lt.s32.totalorder %s1138_s21, %s1138_s21 }
  0x40   :  { %v87_v14 = vcombine.high %v86_v13, %v86_v13  ;;  %v94_v15 = vrot.slane %v86_v13, %v1546_v9  ;;  %p1412_p10 = scmp.ne.s32.totalorder %s1138_s21, %s1411_s22  ;;  %p1417_p12 = scmp.lt.s32.totalorder %s1411_s22, %s1411_s22 }
  0x42   :  { %v1147_v18 = vpack.i.b16 %v94_v15, %v94_v15  ;;  %v105_v19 = vunpack.i.h.s16 %v94_v15  ;;  %v101_v20 = vrot.slane %v87_v14, %v1546_v9  ;;  %v102_v30 = vcombine.high %v94_v15, %v94_v15  ;;  %p1418_p13 = por %p1417_p12, %p1416_p11 }
  0x44   :  { %v116_v22 = vrot.slane %v1147_v18, %v1558_v16  ;;  %v164_v24 = vpack.i.b16 %v105_v19, %v105_v19  ;;  %v107_v25 = vunpack.i.h.s16 %v101_v20  ;;  %v1150_v28 = vpack.i.b16 %v101_v20, %v101_v20  ;;  %p1419_p0 = pnand %p1418_p13, %p1412_p10 }
  0x45   :  { %v109_v36 = vunpack.i.h.s16 %v102_v30  ;;  %v1153_v38 = vpack.i.b16 %v102_v30, %v102_v30  ;;  %v103_v40 = vcombine.high %v101_v20, %v101_v20 }
  0x46   :  { %1215 = vmatmul.mubr.msk.bf16.vlgmr.msra.gmra.mrb[0].mxu0 %vm117_vm1, %v116_v22  ;;  %v168_v26 = vrot.slane %v164_v24, %v1558_v16  ;;  %v266_v29 = vpack.i.b16 %v107_v25, %v107_v25  ;;  %v219_v32 = vrot.slane %v1150_v28, %v1558_v16 }
  0x47   :  { %1225 = vmatpush3.bf16.xpose.msra.mxu0 %v224_v23  ;;  %1226 = vmatprep.mubr.msk.bf16.mxu0 %vm1447_vm0, %v1446_v0  ;;  %v368_v39 = vpack.i.b16 %v109_v36, %v109_v36  ;;  %v321_v42 = vrot.slane %v1153_v38, %v1558_v16  ;;  %v111_v46 = vunpack.i.h.s16 %v103_v40  ;;  %v1156_v48 = vpack.i.b16 %v103_v40, %v103_v40  ;;  %v1159_v38 = vld [vmem:[%s1725_s3] ss:$0 sm:$0xff] }
  0x48   :  { %1221 = vmatmul.mubr.msk.bf16.vlgmr.msra.gmra.mrb[0].mxu1 %vm117_vm1, %v168_v26  ;;  %1236 = vmatprep.subr.bf16.mxu0 %v1446_v0  ;;  %v270_v35 = vrot.slane %v266_v29, %v1558_v16 }
  0x49   :  { %1231 = vmatpush3.bf16.xpose.msra.mxu1 %v275_v27  ;;  %1232 = vmatprep.mubr.msk.bf16.mxu1 %vm1447_vm0, %v1446_v0  ;;  %v372_v45 = vrot.slane %v368_v39, %v1558_v16  ;;  %v470_v49 = vpack.i.b16 %v111_v46, %v111_v46  ;;  %v423_v50 = vrot.slane %v1156_v48, %v1558_v16 }
  0x4a   :  { %1242 = vmatprep.subr.bf16.mxu1 %v1446_v0  ;;  %v572_v48 = vmul.f32 %v1159_v38, %v1544_v8 }
  0x4b   :  { %v474_v52 = vrot.slane %v470_v49, %v1558_v16 }
  0x4e   :  { %1227 = vmatmul.mubr.msk.bf16.vlgmr.msra.gmra.mrb[4].mxu0 %vm117_vm1, %v219_v32  ;;  %v77_v32 = vld [vmem:[%s1724_s2] sm:$0xff] }
  0x4f   :  { %1237 = vmatpush3.bf16.xpose.msra.mxu0 %v326_v34  ;;  %1238 = vmatprep.mubr.msk.bf16.mxu0 %vm1447_vm0, %v1446_v0  ;;  %vm521_vm10 = vcmp.eq.f32.partialorder %v77_v32, 0.0  ;;  %v930_v32 = vsel %vm629_vm2, %v1596_v41, 0 }
  0x50   :  { %1233 = vmatmul.mubr.msk.bf16.vlgmr.msra.gmra.mrb[4].mxu1 %vm117_vm1, %v270_v35  ;;  %1248 = vmatprep.subr.bf16.mxu0 %v1446_v0 }
  0x51   :  { %1243 = vmatpush3.bf16.xpose.msra.mxu1 %v377_v37  ;;  %1244 = vmatprep.mubr.msk.bf16.mxu1 %vm1447_vm0, %v1446_v0 }
  0x52   :  { %1254 = vmatprep.subr.bf16.mxu1 %v1446_v0 }
  0x56   :  { %1239 = vmatmul.mubr.msk.bf16.vlgmr.msra.gmra.mrb[8].mxu0 %vm117_vm1, %v321_v42 }
  0x57   :  { %1249 = vmatpush3.bf16.xpose.msra.mxu0 %v428_v44  ;;  %1250 = vmatprep.mubr.msk.bf16.mxu0 %vm1447_vm0, %v1446_v0 }
  0x58   :  { %1245 = vmatmul.mubr.msk.bf16.vlgmr.msra.gmra.mrb[8].mxu1 %vm117_vm1, %v372_v45  ;;  %1260 = vmatprep.subr.bf16.mxu0 %v1446_v0 }
  0x59   :  { %1255 = vmatpush3.bf16.xpose.msra.mxu1 %v479_v47  ;;  %1256 = vmatprep.mubr.msk.bf16.mxu1 %vm1447_vm0, %v1446_v0 }
  0x5a   :  { %1266 = vmatprep.subr.bf16.mxu1 %v1446_v0 }
  0x5e   :  { %1251 = vmatmul.mubr.msk.bf16.vlgmr.msra.gmra.mrb[12].mxu0 %vm117_vm1, %v423_v50 }
  0x5f   :  { %1261 = vmatpush3.bf16.msra.mxu0 %v630_v51  ;;  %1262 = vmatprep.mubr.msk.bf16.mxu0 %vm1447_vm0, %v1446_v0  ;;  %v573_v51 = vsel %vm117_vm1, %v572_v48, 0.0 }
  0x60   :  { %1257 = vmatmul.mubr.msk.bf16.vlgmr.msra.gmra.mrb[12].mxu1 %vm117_vm1, %v474_v52  ;;  %1272 = vmatprep.subr.bf16.mxu0 %v1446_v0 }
  0x61   :  { %1267 = vmatpush3.bf16.msra.mxu1 %v680_v53  ;;  %1268 = vmatprep.mubr.msk.bf16.mxu1 %vm1447_vm0, %v1446_v0 }
  0x62   :  { %1278 = vmatprep.subr.bf16.mxu1 %v1446_v0 }
 0x119   :  { %v158_v54 = vpop.f32.mrb[0].mxu0 }
 0x11a   :  { %v1216_v55 = vpop.f32.mrb[1].mxu0 }
 0x11b   :  { %v161_v56 = vpop.f32.mrb[2].mxu0  ;;  %v209_v57 = vpop.f32.mrb[0].mxu1 }
 0x11c   :  { %v530_v58 = vrot.slane %v209_v57, 7  ;;  %v1217_v59 = vpop.f32.mrb[3].mxu0  ;;  %v1222_v60 = vpop.f32.mrb[1].mxu1  ;;  %v577_v57 = vstv %s1728_s6 }
 0x11d   :  { %v212_v61 = vpop.f32.mrb[2].mxu1 }
 0x11e   :  { %v532_v62 = vsel %vm531_vm3, %v530_v58, %v158_v54  ;;  %v1223_v63 = vpop.f32.mrb[3].mxu1 }
 0x121   :  { %v260_v1 = vpop.f32.mrb[4].mxu0 }
 0x122   :  { %v533_v2 = vrot.slane %v260_v1, 6  ;;  %v1228_v3 = vpop.f32.mrb[5].mxu0 }
 0x123   :  { %v263_v4 = vpop.f32.mrb[6].mxu0  ;;  %v311_v5 = vpop.f32.mrb[4].mxu1 }
 0x124   :  { %v535_v6 = vsel %vm534_vm4, %v533_v2, %v532_v62  ;;  %v536_v7 = vrot.slane %v311_v5, 5  ;;  %v1229_v10 = vpop.f32.mrb[7].mxu0  ;;  %v1234_v11 = vpop.f32.mrb[5].mxu1 }
 0x125   :  { %v314_v12 = vpop.f32.mrb[6].mxu1 }
 0x126   :  { %v538_v13 = vsel %vm537_vm5, %v536_v7, %v535_v6  ;;  %v1235_v14 = vpop.f32.mrb[7].mxu1 }
 0x129   :  { %v362_v15 = vpop.f32.mrb[8].mxu0 }
 0x12a   :  { %v539_v18 = vrot.slane %v362_v15, 4  ;;  %v1240_v19 = vpop.f32.mrb[9].mxu0 }
 0x12b   :  { %v365_v20 = vpop.f32.mrb[10].mxu0  ;;  %v413_v22 = vpop.f32.mrb[8].mxu1 }
 0x12c   :  { %v541_v23 = vsel %vm540_vm6, %v539_v18, %v538_v13  ;;  %v542_v24 = vrot.slane %v413_v22, 3  ;;  %v1241_v25 = vpop.f32.mrb[11].mxu0  ;;  %v1246_v26 = vpop.f32.mrb[9].mxu1  ;;  %v730_v18 = vsel %vm629_vm2, %v1560_v17, 0  ;;  %v780_v22 = vsel %vm629_vm2, %v1563_v21, 0 }
 0x12d   :  { %v416_v27 = vpop.f32.mrb[10].mxu1  ;;  %v830_v25 = vsel %vm629_vm2, %v1578_v31, 0 }
 0x12e   :  { %v544_v28 = vsel %vm543_vm7, %v542_v24, %v541_v23  ;;  %v1247_v29 = vpop.f32.mrb[11].mxu1  ;;  %v880_v27 = vsel %vm629_vm2, %v1582_v33, 0 }
 0x131   :  { %v464_v30 = vpop.f32.mrb[12].mxu0 }
 0x132   :  { %v545_v34 = vrot.slane %v464_v30, 2  ;;  %v1252_v35 = vpop.f32.mrb[13].mxu0 }
 0x133   :  { %v467_v36 = vpop.f32.mrb[14].mxu0  ;;  %v515_v37 = vpop.f32.mrb[12].mxu1  ;;  %v980_v35 = vsel %vm629_vm2, %v1600_v43, 0  ;;  %v1449_v43 = vmov 0.0|0.0  }
 0x134   :  { %v548_v39 = vrot.slane %v515_v37, 1  ;;  %v1253_v40 = vpop.f32.mrb[15].mxu0  ;;  %v1258_v42 = vpop.f32.mrb[13].mxu1  ;;  %v547_v44 = vsel %vm546_vm8, %v545_v34, %v544_v28 }
 0x135   :  { %v518_v45 = vpop.f32.mrb[14].mxu1  ;;  %v1046_v40 = vld [vmem:[#allocation8] sm:$0xff]  ;;  %v1047_v42 = vld [vmem:[#allocation8 + $0x8] sm:$0xff] }
 0x136   :  { %v1259_v46 = vpop.f32.mrb[15].mxu1  ;;  %v550_v47 = vsel %vm549_vm9, %v548_v39, %v547_v44  ;;  %v1320_v44 = vpack.c.bf16 %v1047_v42, %v1046_v40  ;;  %v1048_v45 = vld [vmem:[#allocation8 + $0x10] sm:$0xff] }
 0x137   :  { %v552_v49 = vsel %vm521_vm10, -1e+09, %v550_v47  ;;  %v1049_v46 = vld [vmem:[#allocation8 + $0x18] sm:$0xff] }
 0x138   :  { %v554_v50 = vsel %vm553_vm11, %v552_v49, -inf  ;;  %v1323_v47 = vpack.c.bf16 %v1049_v46, %v1048_v45 }
 0x139   :  { %555 = vmax.xlane.f32.xlu0 %v554_v50 }
 0x13d   :  { %574 = vadd.xlane.f32.xlu0 %v573_v51 }
 0x1c6   :  { %v556_v52 = vpop.xlane.xlu0 %555 }
 0x1c7   :  { %v557_v53 = vsub.f32 %v552_v49, %v556_v52 }
 0x1c9   :  { %v558_v54 = vmul.f32 1.442695, %v557_v53 }
 0x1ca   :  { %v575_v58 = vpop.xlane.xlu0 %574 }
 0x1cb   :  { %1337 = vpow2.f32 %v558_v54  ;;  %v578_v59 = vadd.f32 %v577_v57, %v575_v58 }
 0x1cd   :  { %v1160_v60 = vmul.f32 -1.442695, %v578_v59 }
 0x1cf   :  { %1339 = vpow2.f32 %v1160_v60 }
 0x1d5   :  { %v1338_v55 = vpop.eup %1337 }
 0x1d6   :  { %v560_v56 = vsel %vm553_vm11, %v1338_v55, 0.0 }
 0x1d7   :  { %561 = vadd.xlane.f32.xlu1 %v560_v56 }
 0x1d9   :  { %v1340_v61 = vpop.eup %1339 }
 0x1da   :  { %v582_v62 = vadd.f32 1.0, %v1340_v61 }
 0x1dc   :  { %1341 = vrcp.f32 %v582_v62 }
 0x1e6   :  { %v1342_v1 = vpop.eup %1341 }
 0x1e7   :  { %v585_v2 = vsub.f32 1.0, %v1342_v1 }
 0x264   :  { %v562_v63 = vpop.xlane.xlu1 %561 }
 0x265   :  { %1343 = vrcp.f32 %v562_v63 }
 0x26f   :  { %v1344_v3 = vpop.eup %1343 }
 0x270   :  { %v564_v4 = vmul.f32 %v1344_v3, %v1338_v55 }
 0x272   :  { %v586_v5 = vmul.f32 %v585_v2, %v564_v4 }
 0x274   :  { %v587_v6 = vpack.c.bf16 %v586_v5, %v586_v5 }
 0x276   :  { %v595_v7 = vrot.slane %v587_v6, %v1546_v9 }
 0x278   :  { %v596_v10 = vcombine.high %v595_v7, %v595_v7  ;;  %v603_v11 = vrot.slane %v595_v7, %v1546_v9 }
 0x27a   :  { %v1161_v12 = vpack.i.b16 %v603_v11, %v603_v11  ;;  %v614_v13 = vunpack.i.h.s16 %v603_v11  ;;  %v610_v14 = vrot.slane %v596_v10, %v1546_v9  ;;  %v611_v24 = vcombine.high %v603_v11, %v603_v11 }
 0x27c   :  { %v625_v15 = vrot.slane %v1161_v12, %v1558_v16  ;;  %v672_v19 = vpack.i.b16 %v614_v13, %v614_v13  ;;  %v616_v23 = vunpack.i.h.s16 %v610_v14  ;;  %v1164_v9 = vpack.i.b16 %v610_v14, %v610_v14 }
 0x27d   :  { %v618_v28 = vunpack.i.h.s16 %v611_v24  ;;  %v1167_v29 = vpack.i.b16 %v611_v24, %v611_v24  ;;  %v612_v30 = vcombine.high %v610_v14, %v610_v14 }
 0x27e   :  { %1263 = vmatmul.mubr.msk.bf16.vlgmr.msra.gmra.mrb[16].mxu0 %vm553_vm11, %v625_v15  ;;  %v676_v20 = vrot.slane %v672_v19, %v1558_v16  ;;  %v772_v17 = vpack.i.b16 %v616_v23, %v616_v23  ;;  %v726_v21 = vrot.slane %v1164_v9, %v1558_v16 }
 0x27f   :  { %1273 = vmatpush3.bf16.msra.mxu0 %v730_v18  ;;  %1274 = vmatprep.mubr.msk.bf16.mxu0 %vm1447_vm0, %v1446_v0  ;;  %v872_v31 = vpack.i.b16 %v618_v28, %v618_v28  ;;  %v826_v33 = vrot.slane %v1167_v29, %v1558_v16  ;;  %v620_v36 = vunpack.i.h.s16 %v612_v30  ;;  %v1170_v37 = vpack.i.b16 %v612_v30, %v612_v30 }
 0x280   :  { %1269 = vmatmul.mubr.msk.bf16.vlgmr.msra.gmra.mrb[16].mxu1 %vm553_vm11, %v676_v20  ;;  %1284 = vmatprep.subr.bf16.mxu0 %v1446_v0  ;;  %v776_v26 = vrot.slane %v772_v17, %v1558_v16 }
 0x281   :  { %1279 = vmatpush3.bf16.msra.mxu1 %v780_v22  ;;  %1280 = vmatprep.mubr.msk.bf16.mxu1 %vm1447_vm0, %v1446_v0  ;;  %v876_v34 = vrot.slane %v872_v31, %v1558_v16  ;;  %v972_v41 = vpack.i.b16 %v620_v36, %v620_v36  ;;  %v926_v38 = vrot.slane %v1170_v37, %v1558_v16 }
 0x282   :  { %1290 = vmatprep.subr.bf16.mxu1 %v1446_v0 }
 0x283   :  { %v976_v39 = vrot.slane %v972_v41, %v1558_v16 }
 0x286   :  { %1275 = vmatmul.mubr.msk.bf16.vlgmr.msra.gmra.mrb[20].mxu0 %vm553_vm11, %v726_v21 }
 0x287   :  { %1285 = vmatpush3.bf16.msra.mxu0 %v830_v25  ;;  %1286 = vmatprep.mubr.msk.bf16.mxu0 %vm1447_vm0, %v1446_v0 }
 0x288   :  { %1281 = vmatmul.mubr.msk.bf16.vlgmr.msra.gmra.mrb[20].mxu1 %vm553_vm11, %v776_v26  ;;  %1296 = vmatprep.subr.bf16.mxu0 %v1446_v0 }
 0x289   :  { %1291 = vmatpush3.bf16.msra.mxu1 %v880_v27  ;;  %1292 = vmatprep.mubr.msk.bf16.mxu1 %vm1447_vm0, %v1446_v0 }
 0x28a   :  { %1302 = vmatprep.subr.bf16.mxu1 %v1446_v0 }
 0x28e   :  { %1287 = vmatmul.mubr.msk.bf16.vlgmr.msra.gmra.mrb[24].mxu0 %vm553_vm11, %v826_v33  ;;  %v1173_v33 = vld [vmem:[%s1727_s5] ss:$0 sm:$0xff] }
 0x28f   :  { %1297 = vmatpush3.bf16.msra.mxu0 %v930_v32  ;;  %1298 = vmatprep.mubr.msk.bf16.mxu0 %vm1447_vm0, %v1446_v0 }
 0x290   :  { %1293 = vmatmul.mubr.msk.bf16.vlgmr.msra.gmra.mrb[24].mxu1 %vm553_vm11, %v876_v34  ;;  %1319 = vmatprep.subr.bf16.mxu0 %v1449_v43 }
 0x291   :  { %1303 = vmatpush3.bf16.msra.mxu1 %v980_v35  ;;  %1304 = vmatprep.mubr.msk.bf16.mxu1 %vm1447_vm0, %v1446_v0 }
 0x296   :  { %1299 = vmatmul.mubr.msk.bf16.vlgmr.msra.gmra.mrb[28].mxu0 %vm553_vm11, %v926_v38 }
 0x297   :  { %1316 = vmatprep.mubr.msk.f32.mxu0 %vm1447_vm0, %v1446_v0  ;;  %1321 = vmatpush3.bf16.msra.mxu0 %v1320_v44 }
 0x298   :  { %1305 = vmatmul.mubr.msk.bf16.vlgmr.msra.gmra.mrb[28].mxu1 %vm553_vm11, %v976_v39  ;;  %1322 = vmatprep.subr.bf16.mxu0 %v1449_v43 }
 0x29b   :  { %1324 = vmatpush3.bf16.msra.mxu0 %v1323_v47 }
 0x351   :  { %v666_v48 = vpop.f32.mrb[16].mxu0 }
 0x352   :  { %v1264_v49 = vpop.f32.mrb[17].mxu0 }
 0x353   :  { %v669_v50 = vpop.f32.mrb[18].mxu0  ;;  %v716_v16 = vpop.f32.mrb[16].mxu1 }
 0x354   :  { %v1030_v51 = vrot.slane %v716_v16, 7  ;;  %v1265_v52 = vpop.f32.mrb[19].mxu0  ;;  %v1270_v0 = vpop.f32.mrb[17].mxu1 }
 0x355   :  { %v719_v53 = vpop.f32.mrb[18].mxu1 }
 0x356   :  { %v1031_v54 = vsel %vm531_vm3, %v1030_v51, %v666_v48  ;;  %v1271_v55 = vpop.f32.mrb[19].mxu1 }
 0x359   :  { %v766_v56 = vpop.f32.mrb[20].mxu0 }
 0x35a   :  { %v1032_v57 = vrot.slane %v766_v56, 6  ;;  %v1276_v58 = vpop.f32.mrb[21].mxu0 }
 0x35b   :  { %v769_v59 = vpop.f32.mrb[22].mxu0  ;;  %v816_v60 = vpop.f32.mrb[20].mxu1 }
 0x35c   :  { %v1033_v61 = vsel %vm534_vm4, %v1032_v57, %v1031_v54  ;;  %v1034_v62 = vrot.slane %v816_v60, 5  ;;  %v1277_v63 = vpop.f32.mrb[23].mxu0  ;;  %v1282_v1 = vpop.f32.mrb[21].mxu1 }
 0x35d   :  { %v819_v2 = vpop.f32.mrb[22].mxu1 }
 0x35e   :  { %v1035_v3 = vsel %vm537_vm5, %v1034_v62, %v1033_v61  ;;  %v1283_v4 = vpop.f32.mrb[23].mxu1 }
 0x361   :  { %v866_v5 = vpop.f32.mrb[24].mxu0 }
 0x362   :  { %v1036_v6 = vrot.slane %v866_v5, 4  ;;  %v1288_v7 = vpop.f32.mrb[25].mxu0 }
 0x363   :  { %v869_v10 = vpop.f32.mrb[26].mxu0  ;;  %v916_v11 = vpop.f32.mrb[24].mxu1 }
 0x364   :  { %v1037_v12 = vsel %vm540_vm6, %v1036_v6, %v1035_v3  ;;  %v1038_v13 = vrot.slane %v916_v11, 3  ;;  %v1289_v14 = vpop.f32.mrb[27].mxu0  ;;  %v1294_v15 = vpop.f32.mrb[25].mxu1 }
 0x365   :  { %v919_v18 = vpop.f32.mrb[26].mxu1 }
 0x366   :  { %v1039_v19 = vsel %vm543_vm7, %v1038_v13, %v1037_v12  ;;  %v1295_v20 = vpop.f32.mrb[27].mxu1 }
 0x369   :  { %v966_v22 = vpop.f32.mrb[28].mxu0 }
 0x36a   :  { %v1040_v23 = vrot.slane %v966_v22, 2  ;;  %v1300_v9 = vpop.f32.mrb[29].mxu0 }
 0x36b   :  { %v969_v17 = vpop.f32.mrb[30].mxu0  ;;  %v1016_v24 = vpop.f32.mrb[28].mxu1 }
 0x36c   :  { %v1041_v21 = vsel %vm546_vm8, %v1040_v23, %v1039_v19  ;;  %v1042_v25 = vrot.slane %v1016_v24, 1  ;;  %v1301_v26 = vpop.f32.mrb[31].mxu0  ;;  %v1306_v27 = vpop.f32.mrb[29].mxu1 }
 0x36d   :  { %v1019_v28 = vpop.f32.mrb[30].mxu1 }
 0x36e   :  { %v1043_v29 = vsel %vm549_vm9, %v1042_v25, %v1041_v21  ;;  %v1307_v31 = vpop.f32.mrb[31].mxu1 }
 0x36f   :  { %v1045_v30 = vadd.f32 %v1043_v29, %v1544_v8 }
 0x371   :  { %1317 = vmatmul.mubr.msk.f32.vlgmr.msra.gmra.mrb[32].mxu0 %vm117_vm1, %v1045_v30 }
 0x444   :  { %v1126_v32 = vpop.f32.mrb[32].mxu0 }
 0x445   :  { %v1127_v34 = vadd.f32 %v1173_v33, %v1126_v32  ;;  %v1318_v35 = vpop.f32.mrb[33].mxu0 }
 0x447   :  { %1130 = vst [vmem:[#allocation9] sm:$0xff] %v1127_v34 }
 0x448   :  { %1422 = shalt.err (!%p1419_p0)
}
 0x449   :  { %s1423_s24 = scalar_lea.hbm %s1729_s7, 128 }
 0x44a   :  { %p1424_p1 = scmp.ne.s32.totalorder %s1729_s7, %s1423_s24  ;;  %p1427_p2 = scmp.lt.u32.totalorder %s1423_s24, %s1729_s7 }
 0x44c   :  { %p1429_p3 = pnand %p1427_p2, %p1424_p1 }
 0x44e   :  { %1432 = shalt.err (!%p1429_p3)
}
 0x44f   :  { %1140 = dma.vmem_to_hbm [thread:$0]  %s1138_s21, 128, %s1729_s7, [#allocation5]  }
 0x450   :  { %1437 = dma.done.wait [#allocation5], 128  }
 0x451   :  { %1438 = vsyncadd [#allocation5], 4294967168 }
 0x452   :  { %1144 = vsyncpa [#allocation4], 1 }
 0x453   :  { %1145 = vsyncpa [#allocation7], 1 }
 0x454   :  { %1146 = vsyncpa [#allocation5], 1 }

</bundles_post_ra>
